<compile_context>
chip_gen: v6e
topology: v6e:2x2x1
jax: 0.10.0
libtpu: 0.0.40
codegen_flags: <defaults>
</compile_context>

<pallas_src>
import functools

import numpy as np
import jax
import jax.numpy as jnp
from jax.experimental import pallas as pl
from jax.experimental.pallas import tpu as pltpu


def _round_up(x, m):
    return (x + m - 1) // m * m


def context_embed_kernel(x_ref, w_ref, out_ref):
    """One row-tile of the fused context projection.

    x_ref:   [tm, F*K]  folded rows of [cur | depot | agent_feats | global_feats] (bf16)
    w_ref:   [F*K, F*D] block-diagonal stacked projection weight (bf16), resident
    out_ref: [tm, F*D]  folded output rows (out_dtype)
    """
    out_ref[...] = jnp.dot(
        x_ref[...], w_ref[...], preferred_element_type=jnp.float32
    ).astype(out_ref.dtype)


def multi_agent_context_embedding(embeddings, current_node, depot_node,
                                  agent_feats, global_feats,
                                  w_agent, w_global, w_ctx, *,
                                  tm=1024, compute_dtype=jnp.bfloat16,
                                  out_dtype=jnp.bfloat16):
    """Forward of BaseMultiAgentContextEmbedding (Identity communication path).

    embeddings:   [B, N, D] f32
    current_node: [B, A] int32, depot_node: [B, A] int32
    agent_feats:  [B, A, Fa] f32, global_feats: [B, Fg] f32
    w_agent: [Fa, D], w_global: [Fg, D], w_ctx: [4D, D]
      NOTE: weights here are [in, out]; nn.Linear.weight is [out, in] -> transpose
      at the API boundary when porting parameters.
    tm: row tile of the folded kernel problem (rounded to a multiple of 16).
    returns: [B, A, D] in out_dtype (default bf16).
    """
    B, N, D = embeddings.shape
    A = current_node.shape[-1]
    Fa = agent_feats.shape[-1]
    Fg = global_feats.shape[-1]
    K = 2 * D + Fa + Fg
    cdt = compute_dtype

    assert w_ctx.shape == (4 * D, D), "w_ctx must be [4D, D] ([in, out])"
    assert w_agent.shape == (Fa, D) and w_global.shape == (Fg, D)

    # ---- weight fusion (tiny wrapper-side matmuls + stack, done once) ----
    hp = jax.lax.Precision.HIGHEST
    w_stack = jnp.concatenate([
        w_ctx[0 * D:1 * D],                                    # cur-node slice   [D, D]
        w_ctx[1 * D:2 * D],                                    # depot slice      [D, D]
        jnp.dot(w_agent, w_ctx[2 * D:3 * D], precision=hp),    # agent-feat path  [Fa, D]
        jnp.dot(w_global, w_ctx[3 * D:4 * D], precision=hp),   # global-feat path [Fg, D]
    ], axis=0)                                                 # [K, D]

    # ---- lane-dense fold: pack F = 128 // D consecutive rows into the lane axis ----
    F = 128 // D if (D < 128 and 128 % D == 0) else 1
    if F > 1:
        # block-diagonal [F*K, F*D]; mathematically exact (zeros contribute nothing)
        w_fold = jnp.kron(jnp.eye(F, dtype=w_stack.dtype), w_stack)
    else:
        w_fold = w_stack
    w_fold = w_fold.astype(cdt)

    # ---- gather_by_index + row-major concat (indexing glue stays in XLA and
    #      fuses with the cast/pad below into a single bf16 slab write) ----
    cur = jnp.take_along_axis(
        embeddings, jnp.broadcast_to(current_node[:, :, None], (B, A, D)), axis=1)
    dep = jnp.take_along_axis(
        embeddings, jnp.broadcast_to(depot_node[:, :, None], (B, A, D)), axis=1)
    gf = jnp.broadcast_to(global_feats[:, None, :], (B, A, Fg))
    M = B * A
    x = jnp.concatenate(
        [cur.reshape(M, D), dep.reshape(M, D),
         agent_feats.reshape(M, Fa), gf.reshape(M, Fg)], axis=-1).astype(cdt)  # [M, K]

    # ---- tile selection: big tiles, multiples of 16, >= 2 grid steps when possible ----
    Mf = -(-M // F)                                        # folded row count
    tm_eff = min(_round_up(max(tm, 16), 16), _round_up(Mf, 16))
    if Mf > 16:                                            # keep >= 2 steps for v7x's 2 TCs
        tm_eff = min(tm_eff, _round_up(-(-Mf // 2), 16))
    tm_eff = max(tm_eff, 16)
    Mp_f = _round_up(Mf, tm_eff)                           # folded, padded row count
    pad = Mp_f * F - M
    if pad:
        x = jnp.pad(x, ((0, pad), (0, 0)))                 # zero rows: 0 @ W = 0, sliced off
    x = x.reshape(Mp_f, F * K)

    # ---- VMEM budget: double-buffered x/out tiles + double-buffered resident weight ----
    in_b = np.dtype(cdt).itemsize
    out_b = np.dtype(out_dtype).itemsize
    vmem_needed = (2 * tm_eff * (F * K) * in_b
                   + 2 * tm_eff * (F * D) * out_b
                   + 2 * (F * K) * (F * D) * in_b)
    # never below the per-chip scoped default, never above v7x's 64 MiB physical
    vmem_limit = int(min(max(2 * vmem_needed, 32 << 20), 64 << 20))

    out = pl.pallas_call(
        context_embed_kernel,
        out_shape=jax.ShapeDtypeStruct((Mp_f, F * D), out_dtype),
        grid_spec=pltpu.PrefetchScalarGridSpec(
            num_scalar_prefetch=0,
            grid=(Mp_f // tm_eff,),
            in_specs=[
                pl.BlockSpec((tm_eff, F * K), lambda i: (i, 0)),  # folded activation rows
                pl.BlockSpec((F * K, F * D), lambda i: (0, 0)),   # weights: fetched once
            ],
            out_specs=pl.BlockSpec((tm_eff, F * D), lambda i: (i, 0)),
        ),
        # "parallel" lets v7x shard the row tiles across its 2 TensorCores; no-op elsewhere.
        compiler_params=pltpu.CompilerParams(
            dimension_semantics=("parallel",),
            vmem_limit_bytes=vmem_limit),
    )(x, w_fold)

    return out.reshape(Mp_f * F, D)[:M].reshape(B, A, D)


if __name__ == "__main__":
    key = jax.random.PRNGKey(0)
    B, A, C, D = 18, 4, 12, 32          # batch, num_agents, num_cities, embed_dim
    Fa, Fg = 3, 2                       # agent_feat_dim, global_feat_dim
    N = A + C                           # total nodes

    ks = jax.random.split(key, 8)
    embeddings = jax.random.normal(ks[0], (B, N, D), jnp.float32)
    current_node = jax.random.randint(ks[1], (B, A), 0, N)
    depot_node = jax.random.randint(ks[2], (B, A), 0, A)
    agent_feats = jax.random.normal(ks[3], (B, A, Fa), jnp.float32)
    global_feats = jax.random.normal(ks[4], (B, Fg), jnp.float32)

    # nn.Linear(in, out, bias=False).weight is [out, in]; we store the transposed [in, out].
    w_agent = jax.random.normal(ks[5], (Fa, D), jnp.float32) / jnp.sqrt(Fa)
    w_global = jax.random.normal(ks[6], (Fg, D), jnp.float32) / jnp.sqrt(Fg)
    w_ctx = jax.random.normal(ks[7], (4 * D, D), jnp.float32) / jnp.sqrt(4 * D)

    # Demo shapes: M=72 rows, D=32 -> fold F=4, 18 folded rows, tm clamps to 16 -> a
    # 2-step "parallel" grid with the last tile zero-padded.  Production default tm=1024.
    fn = jax.jit(functools.partial(multi_agent_context_embedding, tm=1024))
    out = fn(embeddings, current_node, depot_node, agent_feats, global_feats,
             w_agent, w_global, w_ctx)
    out = jax.block_until_ready(out)

    # Module-faithful plain-JAX f32 reference (gather -> proj -> concat -> project).
    hp = jax.lax.Precision.HIGHEST
    cur_ref = jnp.take_along_axis(
        embeddings, jnp.broadcast_to(current_node[:, :, None], (B, A, D)), axis=1)
    dep_ref = jnp.take_along_axis(
        embeddings, jnp.broadcast_to(depot_node[:, :, None], (B, A, D)), axis=1)
    ae_ref = jnp.einsum('baf,fd->bad', agent_feats, w_agent, precision=hp)
    ge_ref = jnp.broadcast_to(
        jnp.dot(global_feats, w_global, precision=hp)[:, None, :], (B, A, D))
    ctx = jnp.concatenate([cur_ref, dep_ref, ae_ref, ge_ref], axis=-1)
    ref = jnp.einsum('bac,cd->bad', ctx, w_ctx, precision=hp)

    assert out.shape == (B, A, D)
    out_f32 = out.astype(jnp.float32)
    max_err = jnp.max(jnp.abs(out_f32 - ref))
    # bf16 activations/weights/output with f32 accumulation -> ~1e-2 absolute error here.
    assert jnp.allclose(out_f32, ref, atol=5e-2, rtol=5e-2), f"max abs err = {max_err}"
    print("KERNEL_OK")
</pallas_src>

<mosaic_0001>
module attributes {stable_mosaic.version = 11 : i64} {
  func.func @context_embed_kernel(%arg0: i32, %arg1: memref<16x276xbf16, #tpu.memory_space<vmem>>, %arg2: memref<276x128xbf16, #tpu.memory_space<vmem>>, %arg3: memref<16x128xbf16, #tpu.memory_space<vmem>>) attributes {dimension_semantics = [#tpu.dimension_semantics<parallel>], iteration_bounds = array<i64: 2>, scalar_prefetch = 0 : i64, scratch_operands = 0 : i64, tpu.core_type = #tpu.core_type<tc>, window_params = [{transform_indices = @transform_0, window_bounds = array<i64: 16, 276>}, {pipeline_mode = #tpu.pipeline_mode<synchronous>, transform_indices = @transform_1, window_bounds = array<i64: 276, 128>}, {transform_indices = @transform_2, window_bounds = array<i64: 16, 128>}]} {
    %c0 = arith.constant 0 : index
    %c0_0 = arith.constant 0 : index
    %0 = vector.load %arg1[%c0, %c0_0] : memref<16x276xbf16, #tpu.memory_space<vmem>>, vector<16x276xbf16>
    %c0_1 = arith.constant 0 : index
    %c0_2 = arith.constant 0 : index
    %1 = vector.load %arg2[%c0_1, %c0_2] : memref<276x128xbf16, #tpu.memory_space<vmem>>, vector<276x128xbf16>
    %cst = arith.constant dense<0.000000e+00> : vector<16x128xf32>
    %2 = tpu.matmul %0, %1, %cst {dimension_numbers = #tpu.dot_dimension_numbers<[1], [0], [0], [1], [0, 0, 1, 1], [], []>} : vector<16x276xbf16>, vector<276x128xbf16>, vector<16x128xf32> -> vector<16x128xf32>
    %3 = arith.truncf %2 : vector<16x128xf32> to vector<16x128xbf16>
    %c0_3 = arith.constant 0 : index
    %c0_4 = arith.constant 0 : index
    %4 = vector.load %arg3[%c0_3, %c0_4] : memref<16x128xbf16, #tpu.memory_space<vmem>>, vector<16x128xbf16>
    tpu.vector_store %arg3[%c0_3, %c0_4], %3 {strides = array<i32>} : memref<16x128xbf16, #tpu.memory_space<vmem>>, vector<16x128xbf16>,
    return
  }
  func.func @transform_0(%arg0: i32) -> (i32, i32) {
    %c0_i32 = arith.constant 0 : i32
    %c0_i32_0 = arith.constant 0 : i32
    return %arg0, %c0_i32 : i32, i32
  }
  func.func @transform_1(%arg0: i32) -> (i32, i32) {
    %c0_i32 = arith.constant 0 : i32
    %c0_i32_0 = arith.constant 0 : i32
    %c0_i32_1 = arith.constant 0 : i32
    return %c0_i32, %c0_i32_0 : i32, i32
  }
  func.func @transform_2(%arg0: i32) -> (i32, i32) {
    %c0_i32 = arith.constant 0 : i32
    %c0_i32_0 = arith.constant 0 : i32
    return %arg0, %c0_i32 : i32, i32
  }
}

</mosaic_0001>

<bundles_post_ra>
// kernel: multi_agent_context_embedding.1
= control target key start
LH: loop header
LB: loop body
LE: loop exit
PB: predicated region body
PF: predicated region fallthrough
CT: control target
= control target key end

     0   :  { %s599_s9 = smov 0   ;;  %s674_s0 = inlined_call_operand.vmem [shape: bf16[32,276], index: 0, kind: input, shape index: {}]   ;;  %s675_s1 = inlined_call_operand.vmem [shape: bf16[276,128], index: 1, kind: input, shape index: {}]   ;;  %s676_s2 = inlined_call_operand.vmem [shape: bf16[32,128], index: 2, kind: output, shape index: {}]  }
   0x1 LB: > { %s466_s10 = sadd.s32 4294967295, %s580_s9   ;;  %p470_p0 = scmp.ge.s32.totalorder %s580_s9, 1  ;;  %s580_s9 = sphi %s599_s9, %s12_s9  }
   0x2   : > { %p114_p1 = scmp.lt.s32.totalorder %s580_s9, 3 }
   0x4   : > { %p115_p2 = pnand %p470_p0, %p114_p1 }
   0x5   : > { %s471_s19 = sshll.u32 (!%p115_p2), %s466_s10, 1 }
   0x6   : > { %118 = sbr.rel (%p115_p2) target bundleno = 250 (0xfa), region = 28  ;;  %p138_p3 = scmp.lt.s32.totalorder (!%p115_p2), %s471_s19, 3 }
   0xb   : > { %v552_v0 = vld [vmem:[%s675_s1 + $0x78] sm:$0xff]   ;;  %v582_v2 = vmov 0.0   ;;  %v554_v3 = vld [vmem:[%s675_s1 + $0x70] sm:$0xff]   ;;  %vm583_vm0 = vmmov 0   ;;  %v556_v5 = vld [vmem:[%s675_s1 + $0x68] sm:$0xff]   ;;  %s678_s19 = smov (!%p138_p3, %s471_s19), 3 }
   0xc   : > { %v553_v1 = vld [vmem:[%s675_s1 + $0x38] sm:$0xff]   ;;  %533 = vmatprep.subr.bf16.mxu1 %v582_v2  ;;  %508 = vmatprep.subr.bf16.mxu0 %v552_v0  ;;  %v555_v4 = vld [vmem:[%s675_s1 + $0x30] sm:$0xff]   ;;  %v557_v6 = vld [vmem:[%s675_s1 + $0x28] sm:$0xff]   ;;  %vm314_vm1 = vcmask 1041408   ;;  %s541_s28 = smul.u32 12, %s678_s19  ;;  %vm310_vm2 = vcmask 162816  }
   0xd   : > { %509 = vmatpush3.bf16.msra.mxu0 %v553_v1  ;;  %537 = vmatprep.mubr.msk.bf16.mxu1 %vm583_vm0, %v582_v2  ;;  %v558_v7 = vld [vmem:[%s675_s1 + $0x60] sm:$0xff]   ;;  %v560_v9 = vld [vmem:[%s675_s1 + $0x58] sm:$0xff]   ;;  %v564_v10 = vld [vmem:[%s675_s1 + $0x88] ss:$0 sps:$4 sm:$0x33]   ;;  %s474_s26 = sshll.u32 %s678_s19, 2 }
   0xe   : > { %510 = vmatprep.subr.bf16.mxu0 %v554_v3  ;;  %v559_v8 = vld [vmem:[%s675_s1 + $0x20] sm:$0xff]   ;;  %v561_v11 = vld [vmem:[%s675_s1 + $0x18] sm:$0xff]   ;;  %v316_v12 = vsel %vm314_vm1, %v564_v10, 0  ;;  %s142_s12 = scalar_lea.vmem %s674_s0, %s541_s28  ;;  %v562_v14 = vld [vmem:[%s675_s1 + $0x50] sm:$0xff]   ;;  %s148_s29 = scalar_lea.vmem %s676_s2, %s474_s26 }
   0xf   : > { %534 = vmatpush3.bf16.msra.mxu1 %v316_v12  ;;  %v567_v13 = vld [vmem:[%s675_s1 + $0x80] sm:$0xff]   ;;  %v570_v15 = vld [vmem:[%s142_s12 + $0x8] ss:$12 sps:$4 sm:$0xff]  }
  0x10   : > { %535 = vmatprep.subr.bf16.mxu1 %v582_v2  ;;  %v563_v16 = vld [vmem:[%s675_s1 + $0x10] sm:$0xff]   ;;  %v565_v18 = vld [vmem:[%s675_s1 + $0x48] sm:$0xff]   ;;  %v568_v20 = vld [vmem:[%s675_s1 + $0x40] sm:$0xff]  }
  0x11   : > { %511 = vmatpush3.bf16.msra.mxu0 %v555_v4  ;;  %v573_v17 = vld [vmem:[%s142_s12 + $0x4] ss:$12 sps:$4 sm:$0xff]   ;;  %v566_v19 = vld [vmem:[%s675_s1 + $0x8] sm:$0xff]  }
  0x12   : > { %512 = vmatprep.subr.bf16.mxu0 %v556_v5  ;;  %350 = vmatprep.mubr.bf16.mxu0 %v573_v17  ;;  %v569_v21 = vld [vmem:[%s675_s1] sm:$0xff]  }
  0x13   : > { %536 = vmatpush3.bf16.msra.mxu1 %v567_v13  ;;  %v571_v22 = vld [vmem:[%s142_s12] ss:$12 sps:$4 sm:$0xff]  }
  0x15   : > { %513 = vmatpush3.bf16.msra.mxu0 %v557_v6 }
  0x16   : > { %514 = vmatprep.subr.bf16.mxu0 %v558_v7  ;;  %538 = vmatmul.mubr.msk.bf16.vlgmr.msra.gmra.mxu1 %vm310_vm2, %v570_v15 }
  0x19   : > { %515 = vmatpush3.bf16.msra.mxu0 %v559_v8 }
  0x1a   : > { %516 = vmatprep.subr.bf16.mxu0 %v560_v9 }
  0x1d   : > { %517 = vmatpush3.bf16.msra.mxu0 %v561_v11 }
  0x1e   : > { %518 = vmatprep.subr.bf16.mxu0 %v562_v14 }
  0x21   : > { %519 = vmatpush3.bf16.msra.mxu0 %v563_v16 }
  0x22   : > { %520 = vmatprep.subr.bf16.mxu0 %v565_v18 }
  0x25   : > { %521 = vmatpush3.bf16.msra.mxu0 %v566_v19 }
  0x26   : > { %522 = vmatprep.subr.bf16.mxu0 %v568_v20 }
  0x29   : > { %523 = vmatpush3.bf16.msra.mxu0 %v569_v21 }
  0x2c   : > { %351 = vmatmul.mubr.bf16.vlgmr.msra.gmra.mxu0 %v571_v22 }
  0xd6   : > { %v393_v23 = vpop.f32.mrf.mxu1 }
  0xd8   : > { %v539_v24 = vpop.f32.mrf.mxu1 }
  0xda   : > { %v396_v25 = vpop.f32.mrf.mxu1 }
  0xdc   : > { %v540_v26 = vpop.f32.mrf.mxu1 }
  0xec   : > { %v524_v27 = vpop.f32.mrf.mxu0 }
  0xee   : > { %v525_v28 = vpop.f32.mrf.mxu0 }
  0xef   : > { %v526_v30 = vadd.f32 %v525_v28, %v524_v27 }
  0xf0   : > { %v527_v29 = vpop.f32.mrf.mxu0 }
  0xf1   : > { %v394_v33 = vadd.f32 %v526_v30, %v393_v23 }
  0xf2   : > { %v528_v31 = vpop.f32.mrf.mxu0 }
  0xf3   : > { %v529_v32 = vadd.f32 %v528_v31, %v527_v29 }
  0xf5   : > { %v397_v34 = vadd.f32 %v529_v32, %v396_v25 }
  0xf7   : > { %v506_v35 = vpack.c.bf16 %v397_v34, %v394_v33 }
  0xf9   : > { %507 = vst [vmem:[%s148_s29] sm:$0xff] %v506_v35  }
  0xfa PF: > { %s12_s9 = sadd.s32 1, %s580_s9  }
  0xfb   : > { %p9_p4 = scmp.ge.s32.totalorder %s12_s9, 4  }
  0xfd   :  { %11 = sbr.rel (!%p9_p4) target bundleno = 1 (0x1), region = 58 }

</bundles_post_ra>
